<compile_context>
chip_gen: v5e
topology: v5e:2x2
jax: 0.10.0
libtpu: 0.0.40
codegen_flags: <defaults>
</compile_context>

<pallas_src>
import jax
import jax.numpy as jnp
from jax.experimental import pallas as pl
from jax.experimental.pallas import tpu as pltpu

_LANES = 128


def _sublane_multiple(dtype) -> int:
    # Min tile is (8,128) for 32-bit dtypes; sub-32-bit dtypes pack along
    # sublanes: bf16 -> (16,128), int8/fp8 -> (32,128).
    itemsize = jnp.dtype(dtype).itemsize
    return max(8, 32 // max(itemsize, 1))


def toynet_kernel(w_ref, x_ref, o_ref):
    # w_ref: SMEM (1, 1) f32 scalar (the statically selected layer's weight).
    # x_ref / o_ref: (TM, 128) lane-dense tiles.
    # nn.Linear(1, 1, bias=False): y = x @ W.T == x * W[0, 0]
    # Exactly load-mul-store: no extra VALU work, no bf16 temporaries (v5e).
    o_ref[...] = (x_ref[...] * w_ref[0, 0]).astype(o_ref.dtype)


def toynet_forward(x, w1, w2, rank=0, tile_rows=1024, min_kernel_elems=2048):
    """Pallas implementation of ToyNet.forward(x, rank).

    x:  (B, 1) input (features-last, like nn.Linear(1, 1, bias=False)).
    w1: (1, 1) layer1.weight    w2: (1, 1) layer2.weight
    rank: Python int; rank % 2 == 1 -> layer1, else layer2 (matches the
          PyTorch f-string `f'layer{1 if rank % 2 == 1 else 2}'`).
    """
    w = w1 if (rank % 2 == 1) else w2
    orig_shape = x.shape
    n = int(x.size)

    # ---- tiny-workload fast path: a standalone kernel launch plus repack is
    # microseconds of fixed overhead for nanoseconds of work; emit a plain
    # (fusable) XLA multiply instead.
    if n <= min_kernel_elems:
        w_s = jnp.asarray(w, jnp.float32).reshape(())
        return (x * w_s).astype(x.dtype)

    w_scalar = jnp.asarray(w, jnp.float32).reshape(1, 1)
    dtype = x.dtype
    itemsize = jnp.dtype(dtype).itemsize
    sub = _sublane_multiple(dtype)

    # ---- lane-dense (rows, 128) view of the flattened input ----------------
    rows = pl.cdiv(n, _LANES)

    tm = max(min(tile_rows, rows), sub)
    tm = pl.cdiv(tm, sub) * sub                       # dtype-aware sublane multiple

    # v7x megacore: guarantee >= 2 steps on the "parallel" row axis when there
    # is enough data, so both TensorCores get a share of the stream.
    if rows >= 2 * sub and pl.cdiv(rows, tm) < 2:
        tm = max(((rows // 2) // sub) * sub, sub)

    rows_padded = pl.cdiv(rows, tm) * tm
    n_padded = rows_padded * _LANES
    num_tiles = rows_padded // tm

    x_flat = jnp.ravel(x)                             # metadata-only for (B, 1)
    needs_pad = n_padded != n
    if needs_pad:
        # Ragged tail: materialize one padded copy (single-use temp slab).
        x_flat = jnp.pad(x_flat, (0, n_padded - n))
    x2d = x_flat.reshape(rows_padded, _LANES)

    # The padded slab is a fresh single-use temp -> safe to scale in place.
    # In the aligned case x2d aliases the caller's buffer, so don't donate it.
    io_aliases = {1: 0} if needs_pad else {}

    if num_tiles >= 3:
        x_spec = pl.BlockSpec((tm, _LANES), lambda i: (i, 0),
                              pipeline_mode=pl.Buffered(3))
    else:
        x_spec = pl.BlockSpec((tm, _LANES), lambda i: (i, 0))

    out2d = pl.pallas_call(
        toynet_kernel,
        out_shape=jax.ShapeDtypeStruct((rows_padded, _LANES), dtype),
        grid_spec=pltpu.PrefetchScalarGridSpec(
            num_scalar_prefetch=0,
            grid=(num_tiles,),
            in_specs=[
                # Selected weight: one f32 scalar in SMEM (whole array, untiled).
                pl.BlockSpec(memory_space=pltpu.MemorySpace.SMEM),
                # Lane-dense input tiles (unmasked full-width vst on output).
                x_spec,
            ],
            out_specs=pl.BlockSpec((tm, _LANES), lambda i: (i, 0)),
        ),
        compiler_params=pltpu.CompilerParams(
            dimension_semantics=("parallel",),
            # <= ~0.5 MiB per tile -> a few MiB total with multi-buffering;
            # safe on v5e/v6e (128 MiB) and v7x (64 MiB physical VMEM).
            vmem_limit_bytes=32 * 1024 * 1024,
        ),
        cost_estimate=pl.CostEstimate(
            flops=n_padded,
            transcendentals=0,
            bytes_accessed=2 * n_padded * itemsize,
        ),
        input_output_aliases=io_aliases,
    )(w_scalar, x2d)

    # Aligned case: [:n] is a full-size slice (no-op) -> reshape only.
    return out2d.reshape(-1)[:n].reshape(orig_shape)


if __name__ == "__main__":
    key = jax.random.PRNGKey(0)

    # ToyNet.__init__: weight.data.zero_(); weight.data += 1  -> all-ones (1,1).
    w1 = jnp.ones((1, 1), dtype=jnp.float32)   # layer1.weight
    w2 = jnp.ones((1, 1), dtype=jnp.float32)   # layer2.weight

    # --- tiny workload from the PyTorch example: (batch=8, in_features=1).
    #     Takes the fused-XLA fast path (no standalone kernel launch).
    x_small = jax.random.normal(key, (8, 1), dtype=jnp.float32)
    out = jax.block_until_ready(toynet_forward(x_small, w1, w2, rank=0))
    assert out.shape == x_small.shape and out.dtype == x_small.dtype
    assert jnp.allclose(out, x_small @ w2.T, atol=1e-6), "mismatch (rank=0)"
    assert jnp.allclose(
        jax.block_until_ready(toynet_forward(x_small, w1, w2, rank=1)),
        x_small @ w1.T, atol=1e-6), "mismatch (rank=1)"

    # Distinguishable weights to prove the trace-time rank selection switches.
    w1d = jnp.full((1, 1), 2.0, dtype=jnp.float32)   # layer1
    w2d = jnp.full((1, 1), 3.0, dtype=jnp.float32)   # layer2

    # --- kernel path, lane-aligned batch (no pad / no tail slice copies):
    #     256 rows x 128 lanes; megacore guard splits it into a 2-step grid.
    xb = jax.random.normal(jax.random.PRNGKey(1), (256 * _LANES, 1), jnp.float32)
    outb = jax.block_until_ready(toynet_forward(xb, w1d, w2d, rank=0))
    assert outb.shape == xb.shape
    assert jnp.allclose(outb, xb @ w2d.T, atol=1e-6), "kernel mismatch (rank=0)"
    outb1 = jax.block_until_ready(toynet_forward(xb, w1d, w2d, rank=1))
    assert jnp.allclose(outb1, xb @ w1d.T, atol=1e-6), "kernel mismatch (rank=1)"

    # --- kernel path, ragged batch (padded tail + in-place aliased temp slab),
    #     small tile forces a multi-step grid with 3-deep input buffering.
    xr = jax.random.normal(jax.random.PRNGKey(2), (3 * 8 * _LANES + 5, 1),
                           jnp.float32)
    outr = jax.block_until_ready(toynet_forward(xr, w1d, w2d, rank=0, tile_rows=8))
    assert outr.shape == xr.shape
    assert jnp.allclose(outr, xr @ w2d.T, atol=1e-6), "kernel mismatch (ragged)"

    print("KERNEL_OK")
</pallas_src>

<mosaic_0001>
module attributes {stable_mosaic.version = 11 : i64} {
  func.func @toynet_kernel(%arg0: i32, %arg1: memref<1x1xf32, #tpu.memory_space<smem>>, %arg2: memref<128x128xf32, #tpu.memory_space<vmem>>, %arg3: memref<128x128xf32, #tpu.memory_space<vmem>>) attributes {dimension_semantics = [#tpu.dimension_semantics<parallel>], iteration_bounds = array<i64: 2>, scalar_prefetch = 0 : i64, scratch_operands = 0 : i64, tpu.core_type = #tpu.core_type<tc>, window_params = [{transform_indices = @transform_0, window_bounds = array<i64: 1, 1>}, {transform_indices = @transform_1, window_bounds = array<i64: 128, 128>}, {transform_indices = @transform_2, window_bounds = array<i64: 128, 128>}]} {
    %c0 = arith.constant 0 : index
    %c0_0 = arith.constant 0 : index
    %0 = vector.load %arg2[%c0, %c0_0] : memref<128x128xf32, #tpu.memory_space<vmem>>, vector<128x128xf32>
    %c0_1 = arith.constant 0 : index
    %c0_2 = arith.constant 0 : index
    %1 = memref.load %arg1[%c0_1, %c0_2] : memref<1x1xf32, #tpu.memory_space<smem>>
    %2 = vector.broadcast %1 : f32 to vector<128x128xf32>
    %3 = arith.mulf %0, %2 : vector<128x128xf32>
    %c0_3 = arith.constant 0 : index
    %c0_4 = arith.constant 0 : index
    %4 = vector.load %arg3[%c0_3, %c0_4] : memref<128x128xf32, #tpu.memory_space<vmem>>, vector<128x128xf32>
    tpu.vector_store %arg3[%c0_3, %c0_4], %3 {strides = array<i32>} : memref<128x128xf32, #tpu.memory_space<vmem>>, vector<128x128xf32>,
    return
  }
  func.func @transform_0(%arg0: i32) -> (i32, i32) {
    %c0_i32 = arith.constant 0 : i32
    %c0_i32_0 = arith.constant 0 : i32
    %c0_i32_1 = arith.constant 0 : i32
    return %c0_i32, %c0_i32_0 : i32, i32
  }
  func.func @transform_1(%arg0: i32) -> (i32, i32) {
    %c0_i32 = arith.constant 0 : i32
    %c0_i32_0 = arith.constant 0 : i32
    return %arg0, %c0_i32 : i32, i32
  }
  func.func @transform_2(%arg0: i32) -> (i32, i32) {
    %c0_i32 = arith.constant 0 : i32
    %c0_i32_0 = arith.constant 0 : i32
    return %arg0, %c0_i32 : i32, i32
  }
}

</mosaic_0001>

<bundles_post_ra>
// kernel: tpu_custom_call.1
= control target key start
LH: loop header
LB: loop body
LE: loop exit
PB: predicated region body
PF: predicated region fallthrough
CT: control target
= control target key end

     0   :  { %s656_s0 = inlined_call_operand.<no memory space> [shape: f32[1,1], index: 0, kind: input, shape index: {}]   ;;  %s657_s1 = inlined_call_operand.hbm [shape: f32[256,128], index: 1, kind: input, shape index: {}]   ;;  %s658_s2 = inlined_call_operand.hbm [shape: f32[256,128], index: 2, kind: output, shape index: {}]  }
   0x1   :  { %7 = sst [smem:[#allocation2]] %s656_s0 }
   0x2   :  { %8 = vsyncpa [#allocation4], 0 }
   0x3   :  { %10 = vsyncpa [#allocation4 + $0x1], 0 }
   0x4   :  { %11 = vsyncpa [#allocation5], 0 }
   0x5   :  { %13 = vsyncpa [#allocation5 + $0x1], 0  ;;  %s492_s11 = smov 0   ;;  %s494_s12 = smov 0  }
   0x6   :  { %s496_s13 = smov 0   ;;  %s498_s14 = smov 0  }
   0x7 LB: > { %s513_s0 = sadd.s32 4294967295, %s468_s14   ;;  %s306_s15 = sadd.s32 4294967294, %s468_s14   ;;  %s468_s14 = sphi %s498_s14, %s668_s14   ;;  %s464_s13 = sphi %s496_s13, %s667_s13   ;;  %s460_s12 = sphi %s494_s12, %s666_s12   ;;  %s456_s11 = sphi %s492_s11, %s665_s11  }
   0x8   : > { %s517_s16 = sadd.s32 1, %s468_s14   ;;  %s47_s17 = sadd.s32 1, %s464_s13 }
   0x9   : > { %s44_s18 = ssub.s32 %s468_s14, %s517_s16  ;;  %p54_p0 = scmp.ne.s32.totalorder %s464_s13, %s460_s12 }
   0xa   : > { %p45_p1 = scmp.eq.s32.totalorder %s44_s18, 0  ;;  %p55_p2 = scmp.eq.s32.totalorder %s468_s14, 0 }
   0xb   : > { %p60_p3 = scmp.ne.s32.totalorder %s460_s12, %s456_s11  ;;  %p61_p4 = scmp.eq.s32.totalorder %s513_s0, 0 }
   0xc   : > { %s529_s19 = scalar_select %p45_p1, %s464_s13, %s47_s17  }
   0xd   : > { %p531_p5 = por %p55_p2, %p54_p0  ;;  %p535_p6 = por %p61_p4, %p60_p3 }
   0xe   : > { %p84_p7 = scmp.eq.s32.totalorder %s513_s0, 1  ;;  %p90_p8 = scmp.eq.s32.totalorder %s306_s15, 1 }
   0xf   : > { %p334_p10 = scmp.lt.s32.totalorder %s468_s14, 2  ;;  %s113_s24 = sand.u32 1, %s464_s13  }
  0x10   : > { %p542_p11 = por %p84_p7, %p54_p0  ;;  %p546_p12 = por %p90_p8, %p60_p3 }
  0x11   : > { %s320_s25 = sshll.u32 %s468_s14, 7  ;;  %s309_s26 = sshll.u32 %s113_s24, 7 }
  0x12   : > { %s122_s29 = scalar_lea.hbm %s657_s1, %s320_s25  ;;  %s117_s3 = scalar_lea.vmem [#allocation3], %s309_s26 }
  0x13   : > { %s123_s30 = sshll.u32 %s122_s29, 4  ;;  %s125_s4 = sshll.u32 %s117_s3, 4  ;;  %s124_s30 = int_to_ptr.hbm [resolvable:$true] %s123_s30  ;;  %s126_s4 = int_to_ptr.vmem [resolvable:$true] %s125_s4 }
  0x14   : > { %p557_p13 = pnand %p334_p10, %p531_p5  ;;  %p312_p0 = scmp.ge.s32.totalorder %s468_s14, 1 }
  0x15   : > { %p133_p1 = scmp.lt.s32.totalorder %s468_s14, 3  ;;  %s114_s6 = scalar_lea.sflag [#allocation4], %s113_s24 }
  0x16   : > { %s372_s7 = sshra.s32 %s124_s30, 4  ;;  %p376_p3 = pneg %p557_p13  ;;  %s373_s7 = int_to_ptr.hbm [resolvable:$true] %s372_s7 }
  0x17   : > { %s374_s8 = scalar_lea.hbm %s373_s7, 128  ;;  %s379_s15 = scalar_lea.hbm %s657_s1, 256 }
  0x18   : > { %p375_p2 = scmp.ne.s32.totalorder %s373_s7, %s374_s8  ;;  %p380_p5 = scmp.lt.s32.totalorder %s373_s7, %s657_s1 }
  0x19   : > { %p381_p8 = scmp.lt.s32.totalorder %s379_s15, %s374_s8 }
  0x1a   : > { %p377_p4 = pnand %p376_p3, %p375_p2 }
  0x1b   : > { %p382_p10 = por %p381_p8, %p380_p5 }
  0x1c   : > { %p378_p7 = pneg %p377_p4 }
  0x1e   : > { %p383_p9 = pnand %p382_p10, %p378_p7 }
  0x20   : > { %386 = shalt.err (!%p383_p9)
}
  0x21   : > { %s470_s20 = smov 128   ;;  %s471_s24 = smov 8  }
  0x22   : > { %329 = dma.hbm_to_vmem [thread:$0]  (!%p557_p13), %s124_s30, 2048, %s126_s4, %s114_s6, %s470_s20, %s470_s20, %s471_s24  }
  0x23   : > { %p134_p2 = pnand %p312_p0, %p133_p1 }
  0x24   : > { %s578_s25 = sand.u32 (!%p134_p2), 1, %s460_s12  }
  0x25   : > { %137 = sbr.rel (%p134_p2) target bundleno = 71 (0x47), region = 28  ;;  %s313_s26 = sshll.u32 (!%p134_p2), %s578_s25, 7 }
  0x26   : > { %s140_s27 = scalar_lea.sflag (!%p134_p2), [#allocation4], %s578_s25  ;;  %s582_s28 = scalar_lea.vmem (!%p134_p2), [#allocation3], %s313_s26 }
  0x2a   : > { %447 = dma.done.wait (%p535_p6), %s140_s27, 2048  }
  0x2b   : > { %449 = vsyncadd (%p535_p6), %s140_s27, 4294965248  ;;  %s183_s29 = sld [smem:[#allocation2]]  ;;  %v167_v0 = vld [vmem:[%s582_s28] sm:$0xff]  ;;  %v168_v2 = vld [vmem:[%s582_s28 + $0x8] sm:$0xff]  ;;  %s595_s21 = scalar_lea.vmem [#allocation6], %s313_s26 }
  0x2c   : > { %v169_v3 = vld [vmem:[%s582_s28 + $0x10] sm:$0xff]  ;;  %v170_v7 = vld [vmem:[%s582_s28 + $0x18] sm:$0xff]  ;;  %v171_v8 = vld [vmem:[%s582_s28 + $0x20] sm:$0xff]  ;;  %s321_s30 = sshll.u32 %s513_s0, 7  ;;  %s230_s0 = sshll.u32 %s595_s21, 4  ;;  %s231_s0 = int_to_ptr.vmem [resolvable:$true] %s230_s0 }
  0x2d   : > { %v172_v9 = vld [vmem:[%s582_s28 + $0x28] sm:$0xff]  ;;  %v173_v11 = vld [vmem:[%s582_s28 + $0x30] sm:$0xff]  ;;  %v174_v13 = vld [vmem:[%s582_s28 + $0x38] sm:$0xff]  ;;  %s229_s5 = scalar_lea.hbm %s658_s2, %s321_s30  ;;  %s218_s7 = scalar_lea.sflag [#allocation5], %s578_s25 }
  0x2e   : > { %v175_v15 = vld [vmem:[%s582_s28 + $0x40] sm:$0xff]  ;;  %v176_v17 = vld [vmem:[%s582_s28 + $0x48] sm:$0xff]  ;;  %v177_v19 = vld [vmem:[%s582_s28 + $0x50] sm:$0xff]  ;;  %s232_s6 = sshll.u32 %s229_s5, 4  ;;  %s422_s17 = scalar_lea.hbm %s658_s2, 256  ;;  %s233_s6 = int_to_ptr.hbm [resolvable:$true] %s232_s6 }
  0x2f   : > { %v178_v21 = vld [vmem:[%s582_s28 + $0x58] sm:$0xff]  ;;  %v179_v23 = vld [vmem:[%s582_s28 + $0x60] sm:$0xff]  ;;  %v180_v25 = vld [vmem:[%s582_s28 + $0x68] sm:$0xff]  ;;  %s416_s8 = sshra.s32 %s233_s6, 4  ;;  %s417_s8 = int_to_ptr.hbm [resolvable:$true] %s416_s8 }
  0x30   : > { %v181_v27 = vld [vmem:[%s582_s28 + $0x70] sm:$0xff]  ;;  %v182_v29 = vld [vmem:[%s582_s28 + $0x78] sm:$0xff]  ;;  %s418_s9 = scalar_lea.hbm %s417_s8, 128  ;;  %p423_p0 = scmp.lt.s32.totalorder %s417_s8, %s658_s2 }
  0x31   : > { %v184_v1 = vstv %s183_s29  ;;  %p419_p6 = scmp.ne.s32.totalorder %s417_s8, %s418_s9  ;;  %p424_p1 = scmp.lt.s32.totalorder %s422_s17, %s418_s9 }
  0x32   : > { %v185_v4 = vmul.f32 %v184_v1, %v167_v0  ;;  %v186_v5 = vmul.f32 %v184_v1, %v168_v2  ;;  %v187_v6 = vmul.f32 %v184_v1, %v169_v3  ;;  %v188_v10 = vmul.f32 %v184_v1, %v170_v7 }
  0x33   : > { %v189_v12 = vmul.f32 %v184_v1, %v171_v8  ;;  %v190_v14 = vmul.f32 %v184_v1, %v172_v9  ;;  %v191_v16 = vmul.f32 %v184_v1, %v173_v11  ;;  %v192_v18 = vmul.f32 %v184_v1, %v174_v13  ;;  %p420_p9 = pnand %p419_p6, %p542_p11  ;;  %p425_p3 = por %p424_p1, %p423_p0 }
  0x34   : > { %201 = vst [vmem:[%s595_s21] sm:$0xff] %v185_v4  ;;  %v193_v20 = vmul.f32 %v184_v1, %v175_v15  ;;  %v194_v22 = vmul.f32 %v184_v1, %v176_v17  ;;  %v195_v24 = vmul.f32 %v184_v1, %v177_v19  ;;  %v196_v26 = vmul.f32 %v184_v1, %v178_v21 }
  0x35   : > { %202 = vst [vmem:[%s595_s21 + $0x8] sm:$0xff] %v186_v5  ;;  %v197_v28 = vmul.f32 %v184_v1, %v179_v23  ;;  %v198_v30 = vmul.f32 %v184_v1, %v180_v25  ;;  %v199_v31 = vmul.f32 %v184_v1, %v181_v27  ;;  %v200_v32 = vmul.f32 %v184_v1, %v182_v29  ;;  %p421_p13 = pneg %p420_p9 }
  0x36   : > { %203 = vst [vmem:[%s595_s21 + $0x10] sm:$0xff] %v187_v6 }
  0x37   : > { %204 = vst [vmem:[%s595_s21 + $0x18] sm:$0xff] %v188_v10  ;;  %p426_p4 = pnand %p425_p3, %p421_p13 }
  0x38   : > { %205 = vst [vmem:[%s595_s21 + $0x20] sm:$0xff] %v189_v12 }
  0x39   : > { %206 = vst [vmem:[%s595_s21 + $0x28] sm:$0xff] %v190_v14 }
  0x3a   : > { %207 = vst [vmem:[%s595_s21 + $0x30] sm:$0xff] %v191_v16 }
  0x3b   : > { %208 = vst [vmem:[%s595_s21 + $0x38] sm:$0xff] %v192_v18 }
  0x3c   : > { %209 = vst [vmem:[%s595_s21 + $0x40] sm:$0xff] %v193_v20 }
  0x3d   : > { %210 = vst [vmem:[%s595_s21 + $0x48] sm:$0xff] %v194_v22 }
  0x3e   : > { %211 = vst [vmem:[%s595_s21 + $0x50] sm:$0xff] %v195_v24 }
  0x3f   : > { %212 = vst [vmem:[%s595_s21 + $0x58] sm:$0xff] %v196_v26 }
  0x40   : > { %213 = vst [vmem:[%s595_s21 + $0x60] sm:$0xff] %v197_v28 }
  0x41   : > { %214 = vst [vmem:[%s595_s21 + $0x68] sm:$0xff] %v198_v30 }
  0x42   : > { %215 = vst [vmem:[%s595_s21 + $0x70] sm:$0xff] %v199_v31 }
  0x43   : > { %216 = vst [vmem:[%s595_s21 + $0x78] sm:$0xff] %v200_v32 }
  0x44   : > { %429 = shalt.err (!%p426_p4)
}
  0x45   : > { %s472_s24 = smov 128   ;;  %s473_s25 = smov 8  }
  0x46   : > { %324 = dma.vmem_to_hbm [thread:$0]  (%p542_p11), %s231_s0, 2048, %s233_s6, %s218_s7, %s472_s24, %s472_s24, %s473_s25  }
  0x47 PF: > { %s247_s26 = sand.u32 1, %s456_s11   ;;  %p664_p7 = scmp.ge.s32.totalorder %s468_s14, 2 }
  0x48   : > { %s248_s27 = scalar_lea.sflag [#allocation5], %s247_s26 }
  0x49   : > { %p331_p5 = pnand %p664_p7, %p546_p12 }
  0x4b   : > { %p332_p8 = pneg %p331_p5 }
  0x4d   : > { %451 = dma.done.wait (%p332_p8), %s248_s27, 2048  }
  0x4e   : > { %453 = vsyncadd (%p332_p8), %s248_s27, 4294965248  ;;  %p16_p10 = scmp.ge.s32.totalorder %s517_s16, 4   ;;  %s665_s11 = smov %s460_s12 }
  0x4f   : > { %s666_s12 = smov %s464_s13  ;;  %s667_s13 = smov %s529_s19 }
  0x50   : > { %s668_s14 = smov %s517_s16  ;;  %18 = sbr.rel (!%p16_p10) target bundleno = 7 (0x7), region = 73 }
  0x55   :  { %254 = vsyncpa [#allocation4], 1 }
  0x56   :  { %256 = vsyncpa [#allocation4 + $0x1], 1 }
  0x57   :  { %257 = vsyncpa [#allocation5], 1 }
  0x58   :  { %259 = vsyncpa [#allocation5 + $0x1], 1 }

</bundles_post_ra>
